<compile_context>
chip_gen: v7x
topology: tpu7x:2x2x1
jax: 0.10.0
libtpu: 0.0.40
codegen_flags: <defaults>
</compile_context>

<pallas_src>
import math
import functools

import jax
import jax.numpy as jnp
from jax.experimental import pallas as pl
from jax.experimental.pallas import tpu as pltpu

GELU_C = math.sqrt(2.0 / math.pi)


def _round_up(n, m):
    return ((n + m - 1) // m) * m


def _sublane_multiple(dtype):
    # Sub-32-bit dtypes pack along sublanes: min row tile 8 (f32) / 16 (bf16) / 32 (8-bit).
    return {4: 8, 2: 16, 1: 32}.get(jnp.dtype(dtype).itemsize, 8)


_VMEM_CAPACITY = None


def _vmem_capacity_bytes():
    """Physical per-core VMEM (64 MiB on v7x, 128 MiB on v5e/v6e)."""
    global _VMEM_CAPACITY
    if _VMEM_CAPACITY is None:
        try:
            cap = int(pltpu.get_tpu_info().vmem_capacity_bytes)
        except Exception:
            cap = 0
        _VMEM_CAPACITY = cap if cap > 0 else 64 * 1024 * 1024  # conservative default
    return _VMEM_CAPACITY


def mlp_kernel(x_ref, w1_ref, b1_ref, w2_ref, b2_ref, o_ref, acc_ref):
    # Grid = (row blocks i, hidden chunks k); k is the reduction ("arbitrary") axis.
    # x_ref:  (tm, F)      w1_ref: (F, th)   b1_ref: (1, th)
    # w2_ref: (th, F)      b2_ref: (1, F)    o_ref:  (tm, F)
    # acc_ref: (tm, F) f32 scratch, resident across the k axis.
    k = pl.program_id(1)

    @pl.when(k == 0)
    def _():
        # Seed the accumulator with the output bias (broadcast over rows).
        acc_ref[...] = jnp.broadcast_to(b2_ref[...], acc_ref.shape)

    x = x_ref[...]
    h = jnp.dot(x, w1_ref[...], preferred_element_type=jnp.float32) + b1_ref[...]
    # tanh-approx GELU (matches the PyTorch reference `gelu`), computed in f32.
    h2 = h * h
    g = 0.5 * h * (1.0 + jnp.tanh(GELU_C * (h + 0.044715 * (h * h2))))
    # Cast to weight dtype so bf16 weights/activations hit the full-rate MXU path.
    g = g.astype(w2_ref.dtype)
    acc_ref[...] += jnp.dot(g, w2_ref[...], preferred_element_type=jnp.float32)

    @pl.when(k == pl.num_programs(1) - 1)
    def _():
        o_ref[...] = acc_ref[...].astype(o_ref.dtype)


@functools.partial(jax.jit, static_argnames=("tm", "th"))
def mlp_forward(x, w1, b1, w2, b2, *, tm=None, th=512):
    """x: (B, S, F); w1: (F, H); b1: (H,); w2: (H, F); b2: (F,).

    Weights are pre-transposed to (in, out) relative to torch.nn.Linear.
    """
    B, S, F = x.shape
    H = w1.shape[1]
    M = B * S

    act_bytes = jnp.dtype(x.dtype).itemsize
    w_bytes = jnp.dtype(w1.dtype).itemsize
    sub = _sublane_multiple(x.dtype)

    # Hidden-chunk size: lane-dense (multiple of 128) and dividing Hp exactly,
    # so the reduction over hidden chunks never sees a ragged (garbage) tail.
    Hp = _round_up(H, 128)
    units = Hp // 128
    t_units = max(1, min(max(th // 128, 1), units))
    while units % t_units:
        t_units -= 1
    th_eff = t_units * 128
    grid_k = Hp // th_eff

    # VMEM budget from physical capacity with ~25% headroom for compiler scratch.
    budget = int(0.75 * _vmem_capacity_bytes())

    def vmem_est(tm_c):
        return (
            2 * tm_c * F * act_bytes          # x tile, double-buffered
            + 2 * tm_c * F * act_bytes        # out tile, double-buffered
            + 2 * 2 * F * th_eff * w_bytes    # W1 + W2 chunks, double-buffered
            + 2 * (th_eff + F) * 4            # bias chunks
            + tm_c * F * 4                    # f32 accumulator scratch
            + 2 * tm_c * th_eff * 4           # f32 h / gelu temporaries
        )

    if tm is None:
        # Biggest row tile that fits the budget: big tiles amortize the ~0.35 us
        # per-grid-step overhead (tm=512 fits on 128 MiB parts, smaller on v7x).
        tm = 128
        for cand in (512, 384, 256, 192, 128):
            if vmem_est(cand) <= budget:
                tm = cand
                break
    tm_eff = min(tm, _round_up(M, sub))
    grid_m = pl.cdiv(M, tm_eff)

    vmem_limit = int(min(budget, max(int(1.5 * vmem_est(tm_eff)), 32 * 1024 * 1024)))

    # Weights: pad the hidden dim up to a multiple of 128. For the usual
    # (H % 128 == 0) case this compiles away; otherwise pre-pad once outside
    # the jitted forward to avoid per-call HBM copies. Padded hidden columns
    # produce gelu(0)=0 against zero W2 rows, so the result is unchanged.
    w1p = jnp.pad(w1, ((0, 0), (0, Hp - H))) if Hp != H else w1
    w2p = jnp.pad(w2, ((0, Hp - H), (0, 0))) if Hp != H else w2
    b1p = (jnp.pad(b1, (0, Hp - H)) if Hp != H else b1).astype(jnp.float32).reshape(1, Hp)
    b2p = b2.astype(jnp.float32).reshape(1, F)

    # Activations: no padding (no extra HBM pass). Blocks use the full F extent;
    # the ragged M tail block is handled by the pipeline's partial writeback.
    x2d = x.reshape(M, F)

    out2d = pl.pallas_call(
        mlp_kernel,
        out_shape=jax.ShapeDtypeStruct((M, F), x.dtype),
        grid_spec=pltpu.PrefetchScalarGridSpec(
            num_scalar_prefetch=0,
            grid=(grid_m, grid_k),
            in_specs=[
                pl.BlockSpec((tm_eff, F), lambda i, k: (i, 0)),      # x rows
                pl.BlockSpec((F, th_eff), lambda i, k: (0, k)),      # W1 chunk
                pl.BlockSpec((1, th_eff), lambda i, k: (0, k)),      # b1 chunk
                pl.BlockSpec((th_eff, F), lambda i, k: (k, 0)),      # W2 chunk
                pl.BlockSpec((1, F), lambda i, k: (0, 0)),           # b2
            ],
            out_specs=pl.BlockSpec((tm_eff, F), lambda i, k: (i, 0)),
            scratch_shapes=[pltpu.VMEM((tm_eff, F), jnp.float32)],
        ),
        compiler_params=pltpu.CompilerParams(
            dimension_semantics=("parallel", "arbitrary"),
            vmem_limit_bytes=vmem_limit,
        ),
    )(x2d, w1p, b1p, w2p, b2p)

    return out2d.reshape(B, S, F)


def reference_mlp(x, w1, b1, w2, b2):
    h = jnp.dot(x, w1) + b1
    g = 0.5 * h * (1.0 + jnp.tanh(GELU_C * (h + 0.044715 * h**3)))
    return jnp.dot(g, w2) + b2


if __name__ == "__main__":
    key = jax.random.PRNGKey(0)

    def make_case(case_key, B, S, F_DIM, H_DIM, random_bias=False):
        kx, kw1, kw2, kb1, kb2 = jax.random.split(case_key, 5)
        x = jax.random.normal(kx, (B, S, F_DIM), dtype=jnp.float32)
        # Conv1D.reset_parameters: weight ~ N(0, 0.02), bias = 0.
        # torch Linear weight is (out, in); we store the transposed (in, out).
        w1 = (0.02 * jax.random.normal(kw1, (H_DIM, F_DIM), dtype=jnp.float32)).T
        w2 = (0.02 * jax.random.normal(kw2, (F_DIM, H_DIM), dtype=jnp.float32)).T
        if random_bias:  # exercise the bias paths in the kernel
            b1 = 0.02 * jax.random.normal(kb1, (H_DIM,), dtype=jnp.float32)
            b2 = 0.02 * jax.random.normal(kb2, (F_DIM,), dtype=jnp.float32)
        else:
            b1 = jnp.zeros((H_DIM,), dtype=jnp.float32)
            b2 = jnp.zeros((F_DIM,), dtype=jnp.float32)
        return x, w1, b1, w2, b2

    k1, k2 = jax.random.split(key)

    # Case 1: module-like small config (B=2, S=8, n_features=32, n_hidden=128).
    x, w1, b1, w2, b2 = make_case(k1, 2, 8, 32, 128)
    out = mlp_forward(x, w1, b1, w2, b2)
    jax.block_until_ready(out)
    ref = reference_mlp(x, w1, b1, w2, b2)
    assert out.shape == x.shape
    assert jnp.allclose(out, ref, atol=1e-4, rtol=1e-4), "case 1 mismatch vs reference"

    # Case 2: ragged row count + multiple row blocks and hidden chunks
    # (exercises the accumulator pipeline, bias seeding and partial tail writeback).
    x, w1, b1, w2, b2 = make_case(k2, 2, 50, 64, 256, random_bias=True)
    out = mlp_forward(x, w1, b1, w2, b2, tm=64, th=128)
    jax.block_until_ready(out)
    ref = reference_mlp(x, w1, b1, w2, b2)
    assert out.shape == x.shape
    assert jnp.allclose(out, ref, atol=1e-4, rtol=1e-4), "case 2 mismatch vs reference"

    print("KERNEL_OK")
</pallas_src>

<mosaic_0001>
module attributes {stable_mosaic.version = 11 : i64} {
  func.func @mlp_kernel(%arg0: i32, %arg1: i32, %arg2: memref<16x32xf32, #tpu.memory_space<vmem>>, %arg3: memref<32x128xf32, #tpu.memory_space<vmem>>, %arg4: memref<1x128xf32, #tpu.memory_space<vmem>>, %arg5: memref<128x32xf32, #tpu.memory_space<vmem>>, %arg6: memref<1x32xf32, #tpu.memory_space<vmem>>, %arg7: memref<16x32xf32, #tpu.memory_space<vmem>>, %arg8: memref<16x32xf32, #tpu.memory_space<vmem>>) attributes {dimension_semantics = [#tpu.dimension_semantics<parallel>, #tpu.dimension_semantics<arbitrary>], iteration_bounds = array<i64: 1, 1>, scalar_prefetch = 0 : i64, scratch_operands = 1 : i64, tpu.core_type = #tpu.core_type<tc>, window_params = [{transform_indices = @transform_0, window_bounds = array<i64: 16, 32>}, {transform_indices = @transform_1, window_bounds = array<i64: 32, 128>}, {transform_indices = @transform_2, window_bounds = array<i64: 1, 128>}, {transform_indices = @transform_3, window_bounds = array<i64: 128, 32>}, {pipeline_mode = #tpu.pipeline_mode<synchronous>, transform_indices = @transform_4, window_bounds = array<i64: 1, 32>}, {transform_indices = @transform_5, window_bounds = array<i64: 16, 32>}]} {
    %c0_i32 = arith.constant 0 : i32
    %0 = arith.cmpi eq, %arg1, %c0_i32 : i32
    %1 = arith.extui %0 : i1 to i32
    %c0_i32_0 = arith.constant 0 : i32
    %2 = arith.cmpi ne, %1, %c0_i32_0 : i32
    scf.if %2 {
      %c0_19 = arith.constant 0 : index
      %c0_20 = arith.constant 0 : index
      %30 = vector.load %arg6[%c0_19, %c0_20] : memref<1x32xf32, #tpu.memory_space<vmem>>, vector<1x32xf32>
      %31 = vector.shape_cast %30 : vector<1x32xf32> to vector<1x32xf32>
      %32 = vector.broadcast %31 : vector<1x32xf32> to vector<16x32xf32>
      %c0_21 = arith.constant 0 : index
      %c0_22 = arith.constant 0 : index
      %33 = vector.load %arg8[%c0_21, %c0_22] : memref<16x32xf32, #tpu.memory_space<vmem>>, vector<16x32xf32>
      tpu.vector_store %arg8[%c0_21, %c0_22], %32 {strides = array<i32>} : memref<16x32xf32, #tpu.memory_space<vmem>>, vector<16x32xf32>,
    } else {
    }
    %c0 = arith.constant 0 : index
    %c0_1 = arith.constant 0 : index
    %3 = vector.load %arg2[%c0, %c0_1] : memref<16x32xf32, #tpu.memory_space<vmem>>, vector<16x32xf32>
    %c0_2 = arith.constant 0 : index
    %c0_3 = arith.constant 0 : index
    %4 = vector.load %arg3[%c0_2, %c0_3] : memref<32x128xf32, #tpu.memory_space<vmem>>, vector<32x128xf32>
    %cst = arith.constant dense<0.000000e+00> : vector<16x128xf32>
    %5 = tpu.matmul %3, %4, %cst {dimension_numbers = #tpu.dot_dimension_numbers<[1], [0], [0], [1], [0, 0, 1, 1], [], []>} : vector<16x32xf32>, vector<32x128xf32>, vector<16x128xf32> -> vector<16x128xf32>
    %c0_4 = arith.constant 0 : index
    %c0_5 = arith.constant 0 : index
    %6 = vector.load %arg4[%c0_4, %c0_5] : memref<1x128xf32, #tpu.memory_space<vmem>>, vector<1x128xf32>
    %7 = vector.broadcast %6 : vector<1x128xf32> to vector<16x128xf32>
    %8 = arith.addf %5, %7 : vector<16x128xf32>
    %9 = arith.mulf %8, %8 : vector<16x128xf32>
    %cst_6 = arith.constant 5.000000e-01 : f32
    %10 = vector.broadcast %cst_6 : f32 to vector<16x128xf32>
    %11 = arith.mulf %10, %8 : vector<16x128xf32>
    %12 = arith.mulf %8, %9 : vector<16x128xf32>
    %cst_7 = arith.constant 4.471500e-02 : f32
    %13 = vector.broadcast %cst_7 : f32 to vector<16x128xf32>
    %14 = arith.mulf %13, %12 : vector<16x128xf32>
    %15 = arith.addf %8, %14 : vector<16x128xf32>
    %cst_8 = arith.constant 0.797884583 : f32
    %16 = vector.broadcast %cst_8 : f32 to vector<16x128xf32>
    %17 = arith.mulf %16, %15 : vector<16x128xf32>
    %18 = math.tanh %17 : vector<16x128xf32>
    %cst_9 = arith.constant 1.000000e+00 : f32
    %19 = vector.broadcast %cst_9 : f32 to vector<16x128xf32>
    %20 = arith.addf %19, %18 : vector<16x128xf32>
    %21 = arith.mulf %11, %20 : vector<16x128xf32>
    %c0_10 = arith.constant 0 : index
    %c0_11 = arith.constant 0 : index
    %22 = vector.load %arg8[%c0_10, %c0_11] : memref<16x32xf32, #tpu.memory_space<vmem>>, vector<16x32xf32>
    %c0_12 = arith.constant 0 : index
    %c0_13 = arith.constant 0 : index
    %23 = vector.load %arg5[%c0_12, %c0_13] : memref<128x32xf32, #tpu.memory_space<vmem>>, vector<128x32xf32>
    %cst_14 = arith.constant dense<0.000000e+00> : vector<16x32xf32>
    %24 = tpu.matmul %21, %23, %cst_14 {dimension_numbers = #tpu.dot_dimension_numbers<[1], [0], [0], [1], [0, 0, 1, 1], [], []>} : vector<16x128xf32>, vector<128x32xf32>, vector<16x32xf32> -> vector<16x32xf32>
    %25 = arith.addf %22, %24 : vector<16x32xf32>
    %c0_15 = arith.constant 0 : index
    %c0_16 = arith.constant 0 : index
    %26 = vector.load %arg8[%c0_15, %c0_16] : memref<16x32xf32, #tpu.memory_space<vmem>>, vector<16x32xf32>
    tpu.vector_store %arg8[%c0_15, %c0_16], %25 {strides = array<i32>} : memref<16x32xf32, #tpu.memory_space<vmem>>, vector<16x32xf32>,
    %c0_i32_17 = arith.constant 0 : i32
    %27 = arith.cmpi eq, %arg1, %c0_i32_17 : i32
    %28 = arith.extui %27 : i1 to i32
    %c0_i32_18 = arith.constant 0 : i32
    %29 = arith.cmpi ne, %28, %c0_i32_18 : i32
    scf.if %29 {
      %c0_19 = arith.constant 0 : index
      %c0_20 = arith.constant 0 : index
      %30 = vector.load %arg8[%c0_19, %c0_20] : memref<16x32xf32, #tpu.memory_space<vmem>>, vector<16x32xf32>
      %c0_21 = arith.constant 0 : index
      %c0_22 = arith.constant 0 : index
      %31 = vector.load %arg7[%c0_21, %c0_22] : memref<16x32xf32, #tpu.memory_space<vmem>>, vector<16x32xf32>
      tpu.vector_store %arg7[%c0_21, %c0_22], %30 {strides = array<i32>} : memref<16x32xf32, #tpu.memory_space<vmem>>, vector<16x32xf32>,
    } else {
    }
    return
  }
  func.func @transform_0(%arg0: i32, %arg1: i32) -> (i32, i32) {
    %c0_i32 = arith.constant 0 : i32
    %c0_i32_0 = arith.constant 0 : i32
    return %arg0, %c0_i32 : i32, i32
  }
  func.func @transform_1(%arg0: i32, %arg1: i32) -> (i32, i32) {
    %c0_i32 = arith.constant 0 : i32
    %c0_i32_0 = arith.constant 0 : i32
    return %c0_i32, %arg1 : i32, i32
  }
  func.func @transform_2(%arg0: i32, %arg1: i32) -> (i32, i32) {
    %c0_i32 = arith.constant 0 : i32
    %c0_i32_0 = arith.constant 0 : i32
    return %c0_i32, %arg1 : i32, i32
  }
  func.func @transform_3(%arg0: i32, %arg1: i32) -> (i32, i32) {
    %c0_i32 = arith.constant 0 : i32
    %c0_i32_0 = arith.constant 0 : i32
    return %arg1, %c0_i32 : i32, i32
  }
  func.func @transform_4(%arg0: i32, %arg1: i32) -> (i32, i32) {
    %c0_i32 = arith.constant 0 : i32
    %c0_i32_0 = arith.constant 0 : i32
    %c0_i32_1 = arith.constant 0 : i32
    return %c0_i32, %c0_i32_0 : i32, i32
  }
  func.func @transform_5(%arg0: i32, %arg1: i32) -> (i32, i32) {
    %c0_i32 = arith.constant 0 : i32
    %c0_i32_0 = arith.constant 0 : i32
    return %arg0, %c0_i32 : i32, i32
  }
}

</mosaic_0001>

<bundles_post_ra>
// kernel: mlp_forward.1
= control target key start
LH: loop header
LB: loop body
LE: loop exit
PB: predicated region body
PF: predicated region fallthrough
CT: control target
= control target key end

     0   :  { %vm32_vm0 = vcmask 261120   ;;  %s538_s0 = inlined_call_operand.vmem [shape: f32[16,32], index: 0, kind: input, shape index: {}]   ;;  %s539_s1 = inlined_call_operand.vmem [shape: f32[32,128], index: 1, kind: input, shape index: {}]   ;;  %s540_s2 = inlined_call_operand.vmem [shape: f32[1,128], index: 2, kind: input, shape index: {}]   ;;  %s541_s3 = inlined_call_operand.vmem [shape: f32[128,32], index: 3, kind: input, shape index: {}]   ;;  %s542_s4 = inlined_call_operand.vmem [shape: f32[1,32], index: 4, kind: input, shape index: {}]   ;;  %s543_s5 = inlined_call_operand.hbm [shape: f32[16,32], index: 5, kind: output, shape index: {}]  }
   0x1   :  { %v37_v0 = vld [vmem:[%s539_s1] sm:$0xff]  ;;  %v38_v1 = vld [vmem:[%s539_s1 + $0x8] sm:$0xff]  ;;  %v39_v2 = vld [vmem:[%s539_s1 + $0x10] sm:$0xff] }
   0x2   :  { %v342_v3 = vpack.c.bf16 %v38_v1, %v37_v0  ;;  %v40_v4 = vld [vmem:[%s539_s1 + $0x18] sm:$0xff]  ;;  %v35_v5 = vld [vmem:[%s538_s0] sm:$0xff]  ;;  %v151_v8 = vld [vmem:[%s541_s3 + $0x8] sm:$0xff] }
   0x3   :  { %v346_v6 = vpack.c.bf16 %v40_v4, %v39_v2  ;;  %304 = vmatprep.mubr.msk.f32.mxu0 %vm32_vm0, %v35_v5  ;;  %v150_v7 = vld [vmem:[%s541_s3] sm:$0xff] }
   0x4   :  { %10 = vsyncpa [#allocation4], 0  ;;  %343 = vmatprep.subr.bf16.mxu0 %v342_v3  ;;  %v350_v9 = vpack.c.bf16 %v151_v8, %v150_v7  ;;  %v36_v10 = vld [vmem:[%s538_s0 + $0x8] sm:$0xff]  ;;  %v152_v11 = vld [vmem:[%s541_s3 + $0x10] sm:$0xff] }
   0x5   :  { %345 = vmatpush3.bf16.msra.mxu0 %v342_v3  ;;  %v153_v12 = vld [vmem:[%s541_s3 + $0x18] sm:$0xff]  ;;  %v154_v14 = vld [vmem:[%s541_s3 + $0x20] sm:$0xff]  ;;  %v155_v15 = vld [vmem:[%s541_s3 + $0x28] sm:$0xff] }
   0x6   :  { %347 = vmatprep.subr.bf16.mxu0 %v346_v6  ;;  %351 = vmatprep.subr.bf16.mxu1 %v350_v9  ;;  %v354_v13 = vpack.c.bf16 %v153_v12, %v152_v11  ;;  %v358_v16 = vpack.c.bf16 %v155_v15, %v154_v14  ;;  %v156_v17 = vld [vmem:[%s541_s3 + $0x30] sm:$0xff]  ;;  %v157_v18 = vld [vmem:[%s541_s3 + $0x38] sm:$0xff]  ;;  %v158_v20 = vld [vmem:[%s541_s3 + $0x40] sm:$0xff] }
   0x7   :  { %353 = vmatpush3.bf16.msra.mxu1 %v350_v9  ;;  %v362_v19 = vpack.c.bf16 %v157_v18, %v156_v17  ;;  %v159_v21 = vld [vmem:[%s541_s3 + $0x48] sm:$0xff]  ;;  %v160_v22 = vld [vmem:[%s541_s3 + $0x50] sm:$0xff]  ;;  %v161_v24 = vld [vmem:[%s541_s3 + $0x58] sm:$0xff] }
   0x8   :  { %355 = vmatprep.subr.bf16.mxu1 %v354_v13  ;;  %v366_v23 = vpack.c.bf16 %v159_v21, %v158_v20  ;;  %v370_v25 = vpack.c.bf16 %v161_v24, %v160_v22  ;;  %v162_v26 = vld [vmem:[%s541_s3 + $0x60] sm:$0xff]  ;;  %v163_v27 = vld [vmem:[%s541_s3 + $0x68] sm:$0xff]  ;;  %v164_v29 = vld [vmem:[%s541_s3 + $0x70] sm:$0xff] }
   0x9   :  { %349 = vmatpush3.bf16.msra.mxu0 %v346_v6  ;;  %v374_v28 = vpack.c.bf16 %v163_v27, %v162_v26  ;;  %v165_v30 = vld [vmem:[%s541_s3 + $0x78] sm:$0xff]  ;;  %v268_v32 = vld [vmem:[%s542_s4] ss:$0 sm:$0xff] }
   0xa   :  { %v378_v31 = vpack.c.bf16 %v165_v30, %v164_v29  ;;  %34 = vst.msk [vmem:[#allocation2 + $0x8] sm:$0xff] %vm32_vm0, %v268_v32  ;;  %33 = vst.msk [vmem:[#allocation2] sm:$0xff] %vm32_vm0, %v268_v32  ;;  %v269_v33 = vld [vmem:[%s540_s2] ss:$0 sm:$0xff]  ;;  %s413_s2 = smov [#allocation3]  }
   0xb   :  { %357 = vmatpush3.bf16.msra.mxu1 %v354_v13  ;;  %s257_s3 = sshll.u32 %s413_s2, 4  ;;  %s258_s3 = int_to_ptr.vmem [resolvable:$true] %s257_s3 }
   0xc   :  { %305 = vmatmul.mubr.msk.f32.vlgmr.msra.gmra.mrb[0].mxu0 %vm32_vm0, %v36_v10  ;;  %359 = vmatprep.subr.bf16.mxu1 %v358_v16  ;;  %s389_s4 = scalar_lea.vmem %s258_s3, 256  ;;  %p394_p1 = scmp.lt.s32.totalorder %s258_s3, %s258_s3 }
   0xd   :  { %p390_p0 = scmp.ne.s32.totalorder %s258_s3, %s389_s4  ;;  %p395_p2 = scmp.lt.s32.totalorder %s389_s4, %s389_s4 }
   0xf   :  { %361 = vmatpush3.bf16.msra.mxu1 %v358_v16  ;;  %p396_p3 = por %p395_p2, %p394_p1 }
  0x10   :  { %363 = vmatprep.subr.bf16.mxu1 %v362_v19 }
  0x11   :  { %v149_v56 = vld [vmem:[#allocation2 + $0x8] sm:$0xff]  ;;  %v148_v57 = vld [vmem:[#allocation2] sm:$0xff]  ;;  %p397_p4 = pnand %p396_p3, %p390_p0 }
  0x13   :  { %365 = vmatpush3.bf16.msra.mxu1 %v362_v19 }
  0x14   :  { %367 = vmatprep.subr.bf16.mxu1 %v366_v23 }
  0x17   :  { %369 = vmatpush3.bf16.msra.mxu1 %v366_v23 }
  0x18   :  { %371 = vmatprep.subr.bf16.mxu1 %v370_v25 }
  0x1b   :  { %373 = vmatpush3.bf16.msra.mxu1 %v370_v25 }
  0x1c   :  { %375 = vmatprep.subr.bf16.mxu1 %v374_v28 }
  0x1f   :  { %377 = vmatpush3.bf16.msra.mxu1 %v374_v28 }
  0x20   :  { %379 = vmatprep.subr.bf16.mxu1 %v378_v31 }
  0x23   :  { %381 = vmatpush3.bf16.msra.mxu1 %v378_v31 }
  0xdf   :  { %v306_v34 = vpop.f32.mrb[0].mxu0 }
  0xe0   :  { %v127_v35 = vadd.f32 %v306_v34, %v269_v33  ;;  %v121_v36 = vpop.f32.mrb[1].mxu0 }
  0xe1   :  { %v122_v37 = vadd.f32 %v269_v33, %v121_v36 }
  0xe2   :  { %v131_v38 = vmul.f32 %v127_v35, %v127_v35  ;;  %v133_v53 = vmul.f32 0.5, %v127_v35 }
  0xe3   :  { %v130_v39 = vmul.f32 %v122_v37, %v122_v37  ;;  %v132_v51 = vmul.f32 0.5, %v122_v37 }
  0xe4   :  { %v135_v40 = vmul.f32 %v131_v38, %v127_v35 }
  0xe5   :  { %v134_v41 = vmul.f32 %v130_v39, %v122_v37 }
  0xe6   :  { %v137_v42 = vmul.f32 0.044715, %v135_v40 }
  0xe7   :  { %v136_v43 = vmul.f32 0.044715, %v134_v41 }
  0xe8   :  { %v139_v44 = vadd.f32 %v137_v42, %v127_v35 }
  0xe9   :  { %v138_v45 = vadd.f32 %v136_v43, %v122_v37 }
  0xea   :  { %v141_v46 = vmul.f32 0.7978846, %v139_v44 }
  0xeb   :  { %v140_v47 = vmul.f32 0.7978846, %v138_v45 }
  0xec   :  { %385 = vtanh.f32 %v141_v46 }
  0xed   :  { %387 = vtanh.f32 %v140_v47 }
  0xf6   :  { %v386_v48 = vpop.eup %385 }
  0xf7   :  { %v388_v49 = vpop.eup %387  ;;  %v145_v50 = vadd.f32 1.0, %v386_v48 }
  0xf8   :  { %v144_v52 = vadd.f32 1.0, %v388_v49 }
  0xf9   :  { %v147_v55 = vmul.f32 %v145_v50, %v133_v53 }
  0xfa   :  { %v146_v54 = vmul.f32 %v144_v52, %v132_v51 }
  0xfc   :  { %339 = vmatprep.mubr.f32.mxu1 %v146_v54 }
  0xfd   :  { %340 = vmatmul.mubr.f32.vlgmr.msra.gmra.mrb[0].mxu1 %v147_v55 }
 0x1d0   :  { %v341_v58 = vpop.f32.mrb[0].mxu1 }
 0x1d1   :  { %v242_v59 = vadd.f32 %v341_v58, %v149_v56  ;;  %v232_v60 = vpop.f32.mrb[1].mxu1 }
 0x1d2   :  { %v241_v61 = vadd.f32 %v232_v60, %v148_v57 }
 0x1d3   :  { %244 = vst.msk [vmem:[#allocation2 + $0x8] sm:$0xff] %vm32_vm0, %v242_v59 }
 0x1d4   :  { %243 = vst.msk [vmem:[#allocation2] sm:$0xff] %vm32_vm0, %v241_v61 }
 0x1da   :  { %v249_v62 = vld [vmem:[#allocation2 + $0x8] sm:$0xff] }
 0x1db   :  { %v248_v63 = vld [vmem:[#allocation2] sm:$0xff]  ;;  %251 = vst.msk [vmem:[#allocation3 + $0x8] sm:$0xff] %vm32_vm0, %v249_v62 }
 0x1dc   :  { %250 = vst.msk [vmem:[#allocation3] sm:$0xff] %vm32_vm0, %v248_v63 }
 0x1dd   :  { %400 = shalt.err (!%p397_p4)
}
 0x1de   :  { %s401_s15 = scalar_lea.hbm %s543_s5, 256 }
 0x1df   :  { %p402_p5 = scmp.ne.s32.totalorder %s543_s5, %s401_s15  ;;  %p405_p6 = scmp.lt.u32.totalorder %s401_s15, %s543_s5 }
 0x1e1   :  { %p407_p7 = pnand %p405_p6, %p402_p5 }
 0x1e3   :  { %410 = shalt.err (!%p407_p7)
}
 0x1e4   :  { %s414_s19 = smov 128   ;;  %s415_s20 = smov 8  }
 0x1e5   :  { %263 = dma.vmem_to_hbm [thread:$0]  %s258_s3, 256, %s543_s5, [#allocation4], %s414_s19, %s414_s19, %s415_s20  }
 0x1e6   :  { %411 = dma.done.wait [#allocation4], 256  }
 0x1e7   :  { %412 = vsyncadd [#allocation4], 4294967040 }
 0x1e8   :  { %267 = vsyncpa [#allocation4], 1 }

</bundles_post_ra>
